<compile_context>
chip_gen: v7x
topology: tpu7x:2x2x1
jax: 0.10.0
libtpu: 0.0.40
codegen_flags: <defaults>
</compile_context>

<pallas_src>
import functools
import math

import jax
import jax.numpy as jnp
from jax.experimental import pallas as pl
from jax.experimental.pallas import tpu as pltpu

EPS = 1e-6


def _layernorm(x, a, b, eps=EPS):
    # torch: mean(-1), std(-1) with Bessel correction, a*(x-mean)/(std+eps)+b
    d = x.shape[-1]
    mean = jnp.mean(x, axis=-1, keepdims=True)
    diff = x - mean
    var = jnp.sum(diff * diff, axis=-1, keepdims=True) * (1.0 / (d - 1))
    inv = pl.reciprocal(jnp.sqrt(var) + eps, approx=True)   # EUP slot, ~free
    return a * diff * inv + b


def encoder_layer_kernel(x_ref, bias_ref,
                         ln1_a_ref, ln1_b_ref,
                         wqkv_ref, bqkv_ref, wo_ref, bo_ref,
                         ln2_a_ref, ln2_b_ref,
                         w1_ref, b1_ref, w2_ref, b2_ref,
                         o_ref, *, num_heads):
    f32 = jnp.float32
    bf16 = jnp.bfloat16

    x = x_ref[...].astype(f32)                      # (N, D), N = B*S
    N, D = x.shape
    H = num_heads
    dk = D // H
    scale = 1.0 / math.sqrt(dk)

    # ---------- sublayer 0: x + MHA(LayerNorm(x)), dropout(p=0) == identity ----------
    xn = _layernorm(x, ln1_a_ref[...], ln1_b_ref[...])

    # Fused q|k|v projection: single (N, D) @ (D, 3D) MXU matmul, bf16 in / f32 acc.
    qkv = jnp.dot(xn.astype(bf16), wqkv_ref[...],
                  preferred_element_type=f32) + bqkv_ref[...]
    q = qkv[:, 0 * D:1 * D]
    k = qkv[:, 1 * D:2 * D]
    v = qkv[:, 2 * D:3 * D]

    # Head-major layout (H, N, dk); heads handled by batched dot_general (no per-head matmul loop).
    def split_heads(t):
        return jnp.stack([t[:, h * dk:(h + 1) * dk] for h in range(H)],
                         axis=0).astype(bf16)

    qh, kh, vh = split_heads(q), split_heads(k), split_heads(v)

    scores = jnp.einsum('hqd,hkd->hqk', qh, kh,
                        preferred_element_type=f32) * scale        # (H, N, N)
    # Block-diagonal additive bias (0 within a batch, -1e30 across batches):
    # lets the whole B*S slab run through one batched attention while keeping
    # the softmax strictly per batch element.
    scores = scores + bias_ref[...][None, :, :]

    m = jnp.max(scores, axis=-1, keepdims=True)
    e = jnp.exp(scores - m)
    p = e * pl.reciprocal(jnp.sum(e, axis=-1, keepdims=True), approx=True)

    ctx = jnp.einsum('hqk,hkd->hqd', p.astype(bf16), vh,
                     preferred_element_type=f32)                   # (H, N, dk)
    # One Wo matmul on the concatenated head outputs (instead of H partial accumulations).
    ctx_cat = jnp.concatenate([ctx[h] for h in range(H)], axis=-1)  # (N, D)
    attn = jnp.dot(ctx_cat.astype(bf16), wo_ref[...],
                   preferred_element_type=f32) + bo_ref[...]

    x1 = x + attn
    # TODO(synk): dropout is treated as identity (p=0.0 / eval mode); no RNG masking.

    # ---------- sublayer 1: x1 + FFN(LayerNorm(x1)) ----------
    xn2 = _layernorm(x1, ln2_a_ref[...], ln2_b_ref[...])
    h1 = jnp.dot(xn2.astype(bf16), w1_ref[...],
                 preferred_element_type=f32) + b1_ref[...]
    h1 = jnp.maximum(h1, 0.0)
    ff = jnp.dot(h1.astype(bf16), w2_ref[...],
                 preferred_element_type=f32) + b2_ref[...]

    o_ref[...] = (x1 + ff).astype(o_ref.dtype)


def encoder_layer_pallas(x, params, num_heads):
    B, S, D = x.shape
    assert D % num_heads == 0
    N = B * S

    # Fuse q/k/v projections; cast matmul weights to bf16 (f32 accumulation in-kernel).
    wqkv = jnp.concatenate([params["wq"], params["wk"], params["wv"]],
                           axis=1).astype(jnp.bfloat16)            # (D, 3D)
    bqkv = jnp.concatenate([params["bq"], params["bk"], params["bv"]], axis=1)  # (1, 3D) f32
    wo = params["wo"].astype(jnp.bfloat16)
    w1 = params["w1"].astype(jnp.bfloat16)
    w2 = params["w2"].astype(jnp.bfloat16)

    # Additive block-diagonal attention bias so all B*S rows share one batched attention.
    batch_id = jnp.arange(N, dtype=jnp.int32) // S
    attn_bias = jnp.where(batch_id[:, None] == batch_id[None, :],
                          0.0, -1e30).astype(jnp.float32)          # (N, N)

    operands = (x.reshape(N, D), attn_bias,
                params["ln1_a"], params["ln1_b"],
                wqkv, bqkv, wo, params["bo"],
                params["ln2_a"], params["ln2_b"],
                w1, params["b1"], w2, params["b2"])

    kernel = functools.partial(encoder_layer_kernel, num_heads=num_heads)
    out = pl.pallas_call(
        kernel,
        out_shape=jax.ShapeDtypeStruct((N, D), x.dtype),
        in_specs=[pl.BlockSpec(memory_space=pltpu.MemorySpace.VMEM)
                  for _ in operands],
        out_specs=pl.BlockSpec(memory_space=pltpu.MemorySpace.VMEM),
    )(*operands)
    return out.reshape(B, S, D)


# ---------------- pure-JAX reference (true f32 semantics, for verification) ----------------
def encoder_layer_ref(x, params, num_heads):
    def ln(t, a, b):
        d = t.shape[-1]
        mean = jnp.mean(t, -1, keepdims=True)
        var = jnp.sum((t - mean) ** 2, -1, keepdims=True) / (d - 1)
        return a * (t - mean) / (jnp.sqrt(var) + EPS) + b

    def body(xb):
        S, D = xb.shape
        dk = D // num_heads
        scale = 1.0 / math.sqrt(dk)
        xn = ln(xb, params["ln1_a"], params["ln1_b"])
        q = xn @ params["wq"] + params["bq"]
        k = xn @ params["wk"] + params["bk"]
        v = xn @ params["wv"] + params["bv"]
        attn = jnp.zeros((S, D), jnp.float32)
        for h in range(num_heads):
            sl = slice(h * dk, (h + 1) * dk)
            s = (q[:, sl] @ k[:, sl].T) * scale
            p = jax.nn.softmax(s, axis=-1)
            attn = attn + (p @ v[:, sl]) @ params["wo"][sl, :]
        x1 = xb + attn + params["bo"]
        xn2 = ln(x1, params["ln2_a"], params["ln2_b"])
        ff = jnp.maximum(xn2 @ params["w1"] + params["b1"], 0.0) @ params["w2"] + params["b2"]
        return x1 + ff
    return jax.vmap(body)(x)


def make_params(key, d_model, d_ff):
    ks = jax.random.split(key, 12)

    def lin(kw, kb, fan_in, fan_out):
        w = jax.random.normal(kw, (fan_in, fan_out), jnp.float32) * 0.05
        b = jax.random.normal(kb, (1, fan_out), jnp.float32) * 0.05
        return w, b

    wq, bq = lin(ks[0], ks[1], d_model, d_model)
    wk, bk = lin(ks[2], ks[3], d_model, d_model)
    wv, bv = lin(ks[4], ks[5], d_model, d_model)
    wo, bo = lin(ks[6], ks[7], d_model, d_model)
    w1, b1 = lin(ks[8], ks[9], d_model, d_ff)
    w2, b2 = lin(ks[10], ks[11], d_ff, d_model)
    return {
        "ln1_a": jnp.ones((1, d_model), jnp.float32),
        "ln1_b": jnp.zeros((1, d_model), jnp.float32),
        "wq": wq, "bq": bq, "wk": wk, "bk": bk, "wv": wv, "bv": bv,
        "wo": wo, "bo": bo,
        "ln2_a": jnp.ones((1, d_model), jnp.float32),
        "ln2_b": jnp.zeros((1, d_model), jnp.float32),
        "w1": w1, "b1": b1, "w2": w2, "b2": b2,
    }


if __name__ == "__main__":
    B, S, D = 2, 8, 32        # batch, sequence, model dim (== EncoderLayer `size`)
    H, D_FF = 4, 64           # attention heads, feed-forward hidden size

    key = jax.random.PRNGKey(0)
    kx, kp = jax.random.split(key)
    x = jax.random.normal(kx, (B, S, D), jnp.float32)
    params = make_params(kp, D, D_FF)

    out = jax.block_until_ready(encoder_layer_pallas(x, params, num_heads=H))
    ref = encoder_layer_ref(x, params, num_heads=H)

    assert out.shape == (B, S, D)
    max_err = jnp.max(jnp.abs(out - ref))
    # Tolerance accounts for bf16 matmul operands + approx reciprocals (f32 accumulation).
    assert jnp.allclose(out, ref, atol=2e-2, rtol=2e-2), f"max abs err {max_err}"

    print("KERNEL_OK")
</pallas_src>

<mosaic_0001>
module attributes {stable_mosaic.version = 11 : i64} {
  func.func @encoder_layer_kernel(%arg0: memref<16x32xf32, #tpu.memory_space<vmem>>, %arg1: memref<16x16xf32, #tpu.memory_space<vmem>>, %arg2: memref<1x32xf32, #tpu.memory_space<vmem>>, %arg3: memref<1x32xf32, #tpu.memory_space<vmem>>, %arg4: memref<32x96xbf16, #tpu.memory_space<vmem>>, %arg5: memref<1x96xf32, #tpu.memory_space<vmem>>, %arg6: memref<32x32xbf16, #tpu.memory_space<vmem>>, %arg7: memref<1x32xf32, #tpu.memory_space<vmem>>, %arg8: memref<1x32xf32, #tpu.memory_space<vmem>>, %arg9: memref<1x32xf32, #tpu.memory_space<vmem>>, %arg10: memref<32x64xbf16, #tpu.memory_space<vmem>>, %arg11: memref<1x64xf32, #tpu.memory_space<vmem>>, %arg12: memref<64x32xbf16, #tpu.memory_space<vmem>>, %arg13: memref<1x32xf32, #tpu.memory_space<vmem>>, %arg14: memref<16x32xf32, #tpu.memory_space<vmem>>) attributes {dimension_semantics = [], scalar_prefetch = 0 : i64, scratch_operands = 0 : i64, tpu.core_type = #tpu.core_type<tc>} {
    %c0 = arith.constant 0 : index
    %c0_0 = arith.constant 0 : index
    %0 = vector.load %arg0[%c0, %c0_0] : memref<16x32xf32, #tpu.memory_space<vmem>>, vector<16x32xf32>
    %c0_1 = arith.constant 0 : index
    %c0_2 = arith.constant 0 : index
    %1 = vector.load %arg2[%c0_1, %c0_2] : memref<1x32xf32, #tpu.memory_space<vmem>>, vector<1x32xf32>
    %c0_3 = arith.constant 0 : index
    %c0_4 = arith.constant 0 : index
    %2 = vector.load %arg3[%c0_3, %c0_4] : memref<1x32xf32, #tpu.memory_space<vmem>>, vector<1x32xf32>
    %cst = arith.constant dense<0.000000e+00> : vector<16xf32>
    %3 = vector.multi_reduction <add>, %0, %cst [1] : vector<16x32xf32> to vector<16xf32>
    %4 = vector.shape_cast %3 : vector<16xf32> to vector<16x1xf32>
    %cst_5 = arith.constant 3.200000e+01 : f32
    %5 = vector.broadcast %cst_5 : f32 to vector<16x1xf32>
    %6 = arith.divf %4, %5 : vector<16x1xf32>
    %7 = vector.broadcast %6 : vector<16x1xf32> to vector<16x32xf32>
    %8 = arith.subf %0, %7 : vector<16x32xf32>
    %9 = arith.mulf %8, %8 : vector<16x32xf32>
    %cst_6 = arith.constant dense<0.000000e+00> : vector<16xf32>
    %10 = vector.multi_reduction <add>, %9, %cst_6 [1] : vector<16x32xf32> to vector<16xf32>
    %11 = vector.shape_cast %10 : vector<16xf32> to vector<16x1xf32>
    %cst_7 = arith.constant 0.0322580636 : f32
    %12 = vector.broadcast %cst_7 : f32 to vector<16x1xf32>
    %13 = arith.mulf %11, %12 : vector<16x1xf32>
    %14 = math.sqrt %13 : vector<16x1xf32>
    %cst_8 = arith.constant 9.99999997E-7 : f32
    %15 = vector.broadcast %cst_8 : f32 to vector<16x1xf32>
    %16 = arith.addf %14, %15 : vector<16x1xf32>
    %17 = tpu.reciprocal %16 {approx = true} : vector<16x1xf32> -> vector<16x1xf32>
    %18 = vector.broadcast %1 : vector<1x32xf32> to vector<16x32xf32>
    %19 = arith.mulf %18, %8 : vector<16x32xf32>
    %20 = vector.broadcast %17 : vector<16x1xf32> to vector<16x32xf32>
    %21 = arith.mulf %19, %20 : vector<16x32xf32>
    %22 = vector.broadcast %2 : vector<1x32xf32> to vector<16x32xf32>
    %23 = arith.addf %21, %22 : vector<16x32xf32>
    %24 = arith.truncf %23 : vector<16x32xf32> to vector<16x32xbf16>
    %c0_9 = arith.constant 0 : index
    %c0_10 = arith.constant 0 : index
    %25 = vector.load %arg4[%c0_9, %c0_10] : memref<32x96xbf16, #tpu.memory_space<vmem>>, vector<32x96xbf16>
    %cst_11 = arith.constant dense<0.000000e+00> : vector<16x96xf32>
    %26 = tpu.matmul %24, %25, %cst_11 {dimension_numbers = #tpu.dot_dimension_numbers<[1], [0], [0], [1], [0, 0, 1, 1], [], []>} : vector<16x32xbf16>, vector<32x96xbf16>, vector<16x96xf32> -> vector<16x96xf32>
    %c0_12 = arith.constant 0 : index
    %c0_13 = arith.constant 0 : index
    %27 = vector.load %arg5[%c0_12, %c0_13] : memref<1x96xf32, #tpu.memory_space<vmem>>, vector<1x96xf32>
    %28 = vector.broadcast %27 : vector<1x96xf32> to vector<16x96xf32>
    %29 = arith.addf %26, %28 : vector<16x96xf32>
    %30 = vector.extract_strided_slice %29 {offsets = [0, 0], sizes = [16, 32], strides = [1, 1]} : vector<16x96xf32> to vector<16x32xf32>
    %31 = vector.extract_strided_slice %29 {offsets = [0, 32], sizes = [16, 32], strides = [1, 1]} : vector<16x96xf32> to vector<16x32xf32>
    %32 = vector.extract_strided_slice %29 {offsets = [0, 64], sizes = [16, 32], strides = [1, 1]} : vector<16x96xf32> to vector<16x32xf32>
    %33 = vector.extract_strided_slice %30 {offsets = [0, 0], sizes = [16, 8], strides = [1, 1]} : vector<16x32xf32> to vector<16x8xf32>
    %34 = vector.extract_strided_slice %30 {offsets = [0, 8], sizes = [16, 8], strides = [1, 1]} : vector<16x32xf32> to vector<16x8xf32>
    %35 = vector.extract_strided_slice %30 {offsets = [0, 16], sizes = [16, 8], strides = [1, 1]} : vector<16x32xf32> to vector<16x8xf32>
    %36 = vector.extract_strided_slice %30 {offsets = [0, 24], sizes = [16, 8], strides = [1, 1]} : vector<16x32xf32> to vector<16x8xf32>
    %37 = vector.shape_cast %33 : vector<16x8xf32> to vector<1x16x8xf32>
    %38 = vector.shape_cast %34 : vector<16x8xf32> to vector<1x16x8xf32>
    %39 = vector.shape_cast %35 : vector<16x8xf32> to vector<1x16x8xf32>
    %40 = vector.shape_cast %36 : vector<16x8xf32> to vector<1x16x8xf32>
    %41 = tpu.concatenate %37, %38, %39, %40 in 0 : vector<1x16x8xf32>, vector<1x16x8xf32>, vector<1x16x8xf32>, vector<1x16x8xf32> -> vector<4x16x8xf32>
    %42 = arith.truncf %41 : vector<4x16x8xf32> to vector<4x16x8xbf16>
    %43 = vector.extract_strided_slice %31 {offsets = [0, 0], sizes = [16, 8], strides = [1, 1]} : vector<16x32xf32> to vector<16x8xf32>
    %44 = vector.extract_strided_slice %31 {offsets = [0, 8], sizes = [16, 8], strides = [1, 1]} : vector<16x32xf32> to vector<16x8xf32>
    %45 = vector.extract_strided_slice %31 {offsets = [0, 16], sizes = [16, 8], strides = [1, 1]} : vector<16x32xf32> to vector<16x8xf32>
    %46 = vector.extract_strided_slice %31 {offsets = [0, 24], sizes = [16, 8], strides = [1, 1]} : vector<16x32xf32> to vector<16x8xf32>
    %47 = vector.shape_cast %43 : vector<16x8xf32> to vector<1x16x8xf32>
    %48 = vector.shape_cast %44 : vector<16x8xf32> to vector<1x16x8xf32>
    %49 = vector.shape_cast %45 : vector<16x8xf32> to vector<1x16x8xf32>
    %50 = vector.shape_cast %46 : vector<16x8xf32> to vector<1x16x8xf32>
    %51 = tpu.concatenate %47, %48, %49, %50 in 0 : vector<1x16x8xf32>, vector<1x16x8xf32>, vector<1x16x8xf32>, vector<1x16x8xf32> -> vector<4x16x8xf32>
    %52 = arith.truncf %51 : vector<4x16x8xf32> to vector<4x16x8xbf16>
    %53 = vector.extract_strided_slice %32 {offsets = [0, 0], sizes = [16, 8], strides = [1, 1]} : vector<16x32xf32> to vector<16x8xf32>
    %54 = vector.extract_strided_slice %32 {offsets = [0, 8], sizes = [16, 8], strides = [1, 1]} : vector<16x32xf32> to vector<16x8xf32>
    %55 = vector.extract_strided_slice %32 {offsets = [0, 16], sizes = [16, 8], strides = [1, 1]} : vector<16x32xf32> to vector<16x8xf32>
    %56 = vector.extract_strided_slice %32 {offsets = [0, 24], sizes = [16, 8], strides = [1, 1]} : vector<16x32xf32> to vector<16x8xf32>
    %57 = vector.shape_cast %53 : vector<16x8xf32> to vector<1x16x8xf32>
    %58 = vector.shape_cast %54 : vector<16x8xf32> to vector<1x16x8xf32>
    %59 = vector.shape_cast %55 : vector<16x8xf32> to vector<1x16x8xf32>
    %60 = vector.shape_cast %56 : vector<16x8xf32> to vector<1x16x8xf32>
    %61 = tpu.concatenate %57, %58, %59, %60 in 0 : vector<1x16x8xf32>, vector<1x16x8xf32>, vector<1x16x8xf32>, vector<1x16x8xf32> -> vector<4x16x8xf32>
    %62 = arith.truncf %61 : vector<4x16x8xf32> to vector<4x16x8xbf16>
    "tpu.trace_start"() <{level = 10 : i32, message = "hqd,hkd->hqk"}> : () -> ()
    %cst_14 = arith.constant dense<0.000000e+00> : vector<4x16x16xf32>
    %63 = tpu.matmul %42, %52, %cst_14 {dimension_numbers = #tpu.dot_dimension_numbers<[2], [2], [1], [1], [0, 0, 0, 1, 1, 1], [0], [0]>} : vector<4x16x8xbf16>, vector<4x16x8xbf16>, vector<4x16x16xf32> -> vector<4x16x16xf32>
    "tpu.trace_stop"() : () -> ()
    %cst_15 = arith.constant 0.353553385 : f32
    %64 = vector.broadcast %cst_15 : f32 to vector<4x16x16xf32>
    %65 = arith.mulf %63, %64 : vector<4x16x16xf32>
    %c0_16 = arith.constant 0 : index
    %c0_17 = arith.constant 0 : index
    %66 = vector.load %arg1[%c0_16, %c0_17] : memref<16x16xf32, #tpu.memory_space<vmem>>, vector<16x16xf32>
    %67 = vector.shape_cast %66 : vector<16x16xf32> to vector<1x16x16xf32>
    %68 = vector.broadcast %67 : vector<1x16x16xf32> to vector<4x16x16xf32>
    %69 = arith.addf %65, %68 : vector<4x16x16xf32>
    %cst_18 = arith.constant dense<0xFF800000> : vector<4x16xf32>
    %70 = vector.multi_reduction <maximumf>, %69, %cst_18 [2] : vector<4x16x16xf32> to vector<4x16xf32>
    %71 = vector.shape_cast %70 : vector<4x16xf32> to vector<4x16x1xf32>
    %72 = vector.broadcast %71 : vector<4x16x1xf32> to vector<4x16x16xf32>
    %73 = arith.subf %69, %72 : vector<4x16x16xf32>
    %74 = math.exp %73 : vector<4x16x16xf32>
    %cst_19 = arith.constant dense<0.000000e+00> : vector<4x16xf32>
    %75 = vector.multi_reduction <add>, %74, %cst_19 [2] : vector<4x16x16xf32> to vector<4x16xf32>
    %76 = vector.shape_cast %75 : vector<4x16xf32> to vector<4x16x1xf32>
    %77 = tpu.reciprocal %76 {approx = true} : vector<4x16x1xf32> -> vector<4x16x1xf32>
    %78 = vector.broadcast %77 : vector<4x16x1xf32> to vector<4x16x16xf32>
    %79 = arith.mulf %74, %78 : vector<4x16x16xf32>
    %80 = arith.truncf %79 : vector<4x16x16xf32> to vector<4x16x16xbf16>
    "tpu.trace_start"() <{level = 10 : i32, message = "hqk,hkd->hqd"}> : () -> ()
    %cst_20 = arith.constant dense<0.000000e+00> : vector<4x16x8xf32>
    %81 = tpu.matmul %80, %62, %cst_20 {dimension_numbers = #tpu.dot_dimension_numbers<[2], [1], [1], [2], [0, 0, 0, 1, 1, 2], [0], [0]>} : vector<4x16x16xbf16>, vector<4x16x8xbf16>, vector<4x16x8xf32> -> vector<4x16x8xf32>
    "tpu.trace_stop"() : () -> ()
    %82 = vector.extract_strided_slice %81 {offsets = [0, 0, 0], sizes = [1, 16, 8], strides = [1, 1, 1]} : vector<4x16x8xf32> to vector<1x16x8xf32>
    %83 = vector.shape_cast %82 : vector<1x16x8xf32> to vector<16x8xf32>
    %84 = vector.extract_strided_slice %81 {offsets = [1, 0, 0], sizes = [1, 16, 8], strides = [1, 1, 1]} : vector<4x16x8xf32> to vector<1x16x8xf32>
    %85 = vector.shape_cast %84 : vector<1x16x8xf32> to vector<16x8xf32>
    %86 = vector.extract_strided_slice %81 {offsets = [2, 0, 0], sizes = [1, 16, 8], strides = [1, 1, 1]} : vector<4x16x8xf32> to vector<1x16x8xf32>
    %87 = vector.shape_cast %86 : vector<1x16x8xf32> to vector<16x8xf32>
    %88 = vector.extract_strided_slice %81 {offsets = [3, 0, 0], sizes = [1, 16, 8], strides = [1, 1, 1]} : vector<4x16x8xf32> to vector<1x16x8xf32>
    %89 = vector.shape_cast %88 : vector<1x16x8xf32> to vector<16x8xf32>
    %90 = tpu.concatenate %83, %85, %87, %89 in 1 : vector<16x8xf32>, vector<16x8xf32>, vector<16x8xf32>, vector<16x8xf32> -> vector<16x32xf32>
    %91 = arith.truncf %90 : vector<16x32xf32> to vector<16x32xbf16>
    %c0_21 = arith.constant 0 : index
    %c0_22 = arith.constant 0 : index
    %92 = vector.load %arg6[%c0_21, %c0_22] : memref<32x32xbf16, #tpu.memory_space<vmem>>, vector<32x32xbf16>
    %cst_23 = arith.constant dense<0.000000e+00> : vector<16x32xf32>
    %93 = tpu.matmul %91, %92, %cst_23 {dimension_numbers = #tpu.dot_dimension_numbers<[1], [0], [0], [1], [0, 0, 1, 1], [], []>} : vector<16x32xbf16>, vector<32x32xbf16>, vector<16x32xf32> -> vector<16x32xf32>
    %c0_24 = arith.constant 0 : index
    %c0_25 = arith.constant 0 : index
    %94 = vector.load %arg7[%c0_24, %c0_25] : memref<1x32xf32, #tpu.memory_space<vmem>>, vector<1x32xf32>
    %95 = vector.broadcast %94 : vector<1x32xf32> to vector<16x32xf32>
    %96 = arith.addf %93, %95 : vector<16x32xf32>
    %97 = arith.addf %0, %96 : vector<16x32xf32>
    %c0_26 = arith.constant 0 : index
    %c0_27 = arith.constant 0 : index
    %98 = vector.load %arg8[%c0_26, %c0_27] : memref<1x32xf32, #tpu.memory_space<vmem>>, vector<1x32xf32>
    %c0_28 = arith.constant 0 : index
    %c0_29 = arith.constant 0 : index
    %99 = vector.load %arg9[%c0_28, %c0_29] : memref<1x32xf32, #tpu.memory_space<vmem>>, vector<1x32xf32>
    %cst_30 = arith.constant dense<0.000000e+00> : vector<16xf32>
    %100 = vector.multi_reduction <add>, %97, %cst_30 [1] : vector<16x32xf32> to vector<16xf32>
    %101 = vector.shape_cast %100 : vector<16xf32> to vector<16x1xf32>
    %cst_31 = arith.constant 3.200000e+01 : f32
    %102 = vector.broadcast %cst_31 : f32 to vector<16x1xf32>
    %103 = arith.divf %101, %102 : vector<16x1xf32>
    %104 = vector.broadcast %103 : vector<16x1xf32> to vector<16x32xf32>
    %105 = arith.subf %97, %104 : vector<16x32xf32>
    %106 = arith.mulf %105, %105 : vector<16x32xf32>
    %cst_32 = arith.constant dense<0.000000e+00> : vector<16xf32>
    %107 = vector.multi_reduction <add>, %106, %cst_32 [1] : vector<16x32xf32> to vector<16xf32>
    %108 = vector.shape_cast %107 : vector<16xf32> to vector<16x1xf32>
    %cst_33 = arith.constant 0.0322580636 : f32
    %109 = vector.broadcast %cst_33 : f32 to vector<16x1xf32>
    %110 = arith.mulf %108, %109 : vector<16x1xf32>
    %111 = math.sqrt %110 : vector<16x1xf32>
    %cst_34 = arith.constant 9.99999997E-7 : f32
    %112 = vector.broadcast %cst_34 : f32 to vector<16x1xf32>
    %113 = arith.addf %111, %112 : vector<16x1xf32>
    %114 = tpu.reciprocal %113 {approx = true} : vector<16x1xf32> -> vector<16x1xf32>
    %115 = vector.broadcast %98 : vector<1x32xf32> to vector<16x32xf32>
    %116 = arith.mulf %115, %105 : vector<16x32xf32>
    %117 = vector.broadcast %114 : vector<16x1xf32> to vector<16x32xf32>
    %118 = arith.mulf %116, %117 : vector<16x32xf32>
    %119 = vector.broadcast %99 : vector<1x32xf32> to vector<16x32xf32>
    %120 = arith.addf %118, %119 : vector<16x32xf32>
    %121 = arith.truncf %120 : vector<16x32xf32> to vector<16x32xbf16>
    %c0_35 = arith.constant 0 : index
    %c0_36 = arith.constant 0 : index
    %122 = vector.load %arg10[%c0_35, %c0_36] : memref<32x64xbf16, #tpu.memory_space<vmem>>, vector<32x64xbf16>
    %cst_37 = arith.constant dense<0.000000e+00> : vector<16x64xf32>
    %123 = tpu.matmul %121, %122, %cst_37 {dimension_numbers = #tpu.dot_dimension_numbers<[1], [0], [0], [1], [0, 0, 1, 1], [], []>} : vector<16x32xbf16>, vector<32x64xbf16>, vector<16x64xf32> -> vector<16x64xf32>
    %c0_38 = arith.constant 0 : index
    %c0_39 = arith.constant 0 : index
    %124 = vector.load %arg11[%c0_38, %c0_39] : memref<1x64xf32, #tpu.memory_space<vmem>>, vector<1x64xf32>
    %125 = vector.broadcast %124 : vector<1x64xf32> to vector<16x64xf32>
    %126 = arith.addf %123, %125 : vector<16x64xf32>
    %cst_40 = arith.constant 0.000000e+00 : f32
    %127 = vector.broadcast %cst_40 : f32 to vector<16x64xf32>
    %128 = arith.maximumf %126, %127 : vector<16x64xf32>
    %129 = arith.truncf %128 : vector<16x64xf32> to vector<16x64xbf16>
    %c0_41 = arith.constant 0 : index
    %c0_42 = arith.constant 0 : index
    %130 = vector.load %arg12[%c0_41, %c0_42] : memref<64x32xbf16, #tpu.memory_space<vmem>>, vector<64x32xbf16>
    %cst_43 = arith.constant dense<0.000000e+00> : vector<16x32xf32>
    %131 = tpu.matmul %129, %130, %cst_43 {dimension_numbers = #tpu.dot_dimension_numbers<[1], [0], [0], [1], [0, 0, 1, 1], [], []>} : vector<16x64xbf16>, vector<64x32xbf16>, vector<16x32xf32> -> vector<16x32xf32>
    %c0_44 = arith.constant 0 : index
    %c0_45 = arith.constant 0 : index
    %132 = vector.load %arg13[%c0_44, %c0_45] : memref<1x32xf32, #tpu.memory_space<vmem>>, vector<1x32xf32>
    %133 = vector.broadcast %132 : vector<1x32xf32> to vector<16x32xf32>
    %134 = arith.addf %131, %133 : vector<16x32xf32>
    %135 = arith.addf %97, %134 : vector<16x32xf32>
    %c0_46 = arith.constant 0 : index
    %c0_47 = arith.constant 0 : index
    %136 = vector.load %arg14[%c0_46, %c0_47] : memref<16x32xf32, #tpu.memory_space<vmem>>, vector<16x32xf32>
    tpu.vector_store %arg14[%c0_46, %c0_47], %135 {strides = array<i32>} : memref<16x32xf32, #tpu.memory_space<vmem>>, vector<16x32xf32>,
    return
  }
}

</mosaic_0001>

<bundles_post_ra>
// kernel: tpu_custom_call.1
= control target key start
LH: loop header
LB: loop body
LE: loop exit
PB: predicated region body
PF: predicated region fallthrough
CT: control target
= control target key end

     0   :  { %19 = vsyncpa [#allocation3], 0  ;;  %s1838_s0 = inlined_call_operand.vmem [shape: f32[16,32], index: 0, kind: input, shape index: {}]   ;;  %s1839_s1 = inlined_call_operand.vmem [shape: f32[16,16], index: 1, kind: input, shape index: {}]   ;;  %s1840_s2 = inlined_call_operand.vmem [shape: f32[1,32], index: 2, kind: input, shape index: {}]   ;;  %s1841_s3 = inlined_call_operand.vmem [shape: f32[1,32], index: 3, kind: input, shape index: {}]   ;;  %s1842_s4 = inlined_call_operand.vmem [shape: bf16[32,96], index: 4, kind: input, shape index: {}]   ;;  %s1843_s5 = inlined_call_operand.hbm [shape: f32[1,96], index: 5, kind: input, shape index: {}]   ;;  %s1844_s6 = inlined_call_operand.hbm [shape: bf16[32,32], index: 6, kind: input, shape index: {}]   ;;  %s1845_s7 = inlined_call_operand.hbm [shape: f32[1,32], index: 7, kind: input, shape index: {}]   ;;  %s1846_s8 = inlined_call_operand.hbm [shape: f32[1,32], index: 8, kind: input, shape index: {}]   ;;  %s1847_s9 = inlined_call_operand.hbm [shape: f32[1,32], index: 9, kind: input, shape index: {}]   ;;  %s1848_s10 = inlined_call_operand.vmem [shape: bf16[32,64], index: 10, kind: input, shape index: {}]   ;;  %s1849_s11 = inlined_call_operand.vmem [shape: f32[1,64], index: 11, kind: input, shape index: {}]   ;;  %s1850_s12 = inlined_call_operand.vmem [shape: bf16[64,32], index: 12, kind: input, shape index: {}]   ;;  %s1851_s13 = inlined_call_operand.vmem [shape: f32[1,32], index: 13, kind: input, shape index: {}]   ;;  %s1852_s14 = inlined_call_operand.hbm [shape: f32[16,32], index: 14, kind: output, shape index: {}]  }
   0x1   :  { %20 = vsyncpa [#allocation6], 0 }
   0x2   :  { %21 = vsyncpa [#allocation9], 0 }
   0x3   :  { %22 = vsyncpa [#allocation4], 0  ;;  %s1490_s29 = smov [#allocation5]   ;;  %s1350_s17 = scalar_lea.hbm %s1844_s6, 256 }
   0x4   :  { %s48_s30 = sshll.u32 %s1490_s29, 4  ;;  %p1351_p0 = scmp.ne.s32.totalorder %s1844_s6, %s1350_s17  ;;  %s49_s30 = int_to_ptr.vmem [resolvable:$true] %s48_s30 }
   0x5   :  { %p1354_p1 = scmp.lt.u32.totalorder %s1350_s17, %s1844_s6 }
   0x7   :  { %p1356_p2 = pnand %p1354_p1, %p1351_p0 }
   0x9   :  { %1359 = shalt.err (!%p1356_p2)
}
   0xa   :  { %s1360_s22 = scalar_lea.vmem %s49_s30, 256  ;;  %p1365_p4 = scmp.lt.s32.totalorder %s49_s30, %s49_s30 }
   0xb   :  { %p1361_p3 = scmp.ne.s32.totalorder %s49_s30, %s1360_s22  ;;  %p1366_p5 = scmp.lt.s32.totalorder %s1360_s22, %s1360_s22 }
   0xd   :  { %p1367_p6 = por %p1366_p5, %p1365_p4 }
   0xf   :  { %p1368_p7 = pnand %p1367_p6, %p1361_p3 }
  0x11   :  { %1371 = shalt.err (!%p1368_p7)
}
  0x12   :  { %s1491_s23 = smov 64   ;;  %s1492_s24 = smov 4  }
  0x13   :  { %54 = dma.hbm_to_vmem [thread:$0]  %s1844_s6, 256, %s49_s30, [#allocation6], %s1491_s23, %s1491_s23, %s1492_s24  }
  0x14   :  { %s1493_s27 = smov [#allocation8]   ;;  %s1494_s29 = smov [#allocation2]  }
  0x15   :  { %s71_s28 = sshll.u32 %s1493_s27, 4  ;;  %s39_s15 = sshll.u32 %s1494_s29, 4  ;;  %s72_s28 = int_to_ptr.vmem [resolvable:$true] %s71_s28  ;;  %s40_s15 = int_to_ptr.vmem [resolvable:$true] %s39_s15 }
  0x16   :  { %s1372_s18 = scalar_lea.hbm %s1846_s8, 16 }
  0x17   :  { %p1373_p8 = scmp.ne.s32.totalorder %s1846_s8, %s1372_s18  ;;  %p1376_p9 = scmp.lt.u32.totalorder %s1372_s18, %s1846_s8 }
  0x19   :  { %p1378_p10 = pnand %p1376_p9, %p1373_p8 }
  0x1b   :  { %1381 = shalt.err (!%p1378_p10)
}
  0x1c   :  { %s1382_s6 = scalar_lea.vmem %s72_s28, 16  ;;  %s1386_s30 = scalar_lea.vmem %s72_s28, 32 }
  0x1d   :  { %p1383_p11 = scmp.ne.s32.totalorder %s72_s28, %s1382_s6  ;;  %p1387_p12 = scmp.lt.s32.totalorder %s72_s28, %s72_s28 }
  0x1e   :  { %p1388_p13 = scmp.lt.s32.totalorder %s1386_s30, %s1382_s6 }
  0x20   :  { %p1389_p0 = por %p1388_p13, %p1387_p12 }
  0x22   :  { %p1390_p1 = pnand %p1389_p0, %p1383_p11 }
  0x24   :  { %1393 = shalt.err (!%p1390_p1)
}
  0x25   :  { %74 = dma.hbm_to_vmem [thread:$0]  %s1846_s8, 16, %s72_s28, [#allocation9]  }
  0x26   :  { %s1394_s29 = scalar_lea.hbm %s1843_s5, 16 }
  0x27   :  { %p1395_p2 = scmp.ne.s32.totalorder %s1843_s5, %s1394_s29  ;;  %p1398_p3 = scmp.lt.u32.totalorder %s1394_s29, %s1843_s5 }
  0x29   :  { %p1400_p4 = pnand %p1398_p3, %p1395_p2 }
  0x2b   :  { %1403 = shalt.err (!%p1400_p4)
}
  0x2c   :  { %s1404_s20 = scalar_lea.vmem %s40_s15, 16  ;;  %s1408_s21 = scalar_lea.vmem %s40_s15, 32 }
  0x2d   :  { %p1405_p5 = scmp.ne.s32.totalorder %s40_s15, %s1404_s20  ;;  %p1409_p6 = scmp.lt.s32.totalorder %s40_s15, %s40_s15 }
  0x2e   :  { %p1410_p7 = scmp.lt.s32.totalorder %s1408_s21, %s1404_s20 }
  0x30   :  { %p1411_p8 = por %p1410_p7, %p1409_p6 }
  0x32   :  { %p1412_p9 = pnand %p1411_p8, %p1405_p5 }
  0x34   :  { %1415 = shalt.err (!%p1412_p9)
}
  0x35   :  { %42 = dma.hbm_to_vmem [thread:$0]  %s1843_s5, 16, %s40_s15, [#allocation3]  }
  0x36   :  { %s1495_s22 = smov [#allocation7]   ;;  %s1496_s30 = smov [#allocation10]  }
  0x37   :  { %s61_s6 = sshll.u32 %s1495_s22, 4  ;;  %s81_s24 = sshll.u32 %s1496_s30, 4  ;;  %s62_s6 = int_to_ptr.vmem [resolvable:$true] %s61_s6  ;;  %s82_s24 = int_to_ptr.vmem [resolvable:$true] %s81_s24 }
  0x38   :  { %s1416_s27 = scalar_lea.hbm %s1845_s7, 16 }
  0x39   :  { %p1417_p10 = scmp.ne.s32.totalorder %s1845_s7, %s1416_s27  ;;  %p1420_p11 = scmp.lt.u32.totalorder %s1416_s27, %s1845_s7 }
  0x3b   :  { %p1422_p12 = pnand %p1420_p11, %p1417_p10 }
  0x3d   :  { %1425 = shalt.err (!%p1422_p12)
}
  0x3e   :  { %s1426_s5 = scalar_lea.vmem %s62_s6, 16  ;;  %s1430_s15 = scalar_lea.vmem %s62_s6, 32 }
  0x3f   :  { %p1427_p13 = scmp.ne.s32.totalorder %s62_s6, %s1426_s5  ;;  %p1431_p0 = scmp.lt.s32.totalorder %s62_s6, %s62_s6 }
  0x40   :  { %p1432_p1 = scmp.lt.s32.totalorder %s1430_s15, %s1426_s5 }
  0x42   :  { %p1433_p2 = por %p1432_p1, %p1431_p0 }
  0x44   :  { %p1434_p3 = pnand %p1433_p2, %p1427_p13 }
  0x46   :  { %1437 = shalt.err (!%p1434_p3)
}
  0x47   :  { %64 = dma.hbm_to_vmem [thread:$0]  %s1845_s7, 16, %s62_s6, [#allocation6]  }
  0x48   :  { %s1438_s28 = scalar_lea.hbm %s1847_s9, 16 }
  0x49   :  { %p1439_p4 = scmp.ne.s32.totalorder %s1847_s9, %s1438_s28  ;;  %p1442_p5 = scmp.lt.u32.totalorder %s1438_s28, %s1847_s9 }
  0x4b   :  { %p1444_p6 = pnand %p1442_p5, %p1439_p4 }
  0x4d   :  { %1447 = shalt.err (!%p1444_p6)
}
  0x4e   :  { %s1448_s27 = scalar_lea.vmem %s82_s24, 16  ;;  %s1452_s29 = scalar_lea.vmem %s82_s24, 32 }
  0x4f   :  { %p1449_p7 = scmp.ne.s32.totalorder %s82_s24, %s1448_s27  ;;  %p1453_p8 = scmp.lt.s32.totalorder %s82_s24, %s82_s24 }
  0x50   :  { %p1454_p9 = scmp.lt.s32.totalorder %s1452_s29, %s1448_s27 }
  0x52   :  { %p1455_p10 = por %p1454_p9, %p1453_p8 }
  0x54   :  { %p1456_p11 = pnand %p1455_p10, %p1449_p7 }
  0x56   :  { %1459 = shalt.err (!%p1456_p11)
}
  0x57   :  { %84 = dma.hbm_to_vmem [thread:$0]  %s1847_s9, 16, %s82_s24, [#allocation9]  }
  0x58   :  { %1482 = dma.done.wait [#allocation3], 16  }
  0x59   :  { %1483 = vsyncadd [#allocation3], 4294967280 }
  0x5a   :  { %1484 = dma.done.wait [#allocation6], 272  }
  0x5b   :  { %1485 = vsyncadd [#allocation6], 4294967024 }
  0x5c   :  { %1486 = dma.done.wait [#allocation9], 32  }
  0x5d   :  { %1487 = vsyncadd [#allocation9], 4294967264  ;;  %vm113_vm0 = vcmask 261120   ;;  %v1648_v0 = vld [vmem:[%s1838_s0] sm:$0xff]  ;;  %v1653_v1 = vld [vmem:[%s1838_s0 + $0x8] sm:$0xff]  ;;  %v1497_v15 = vmov 0.0  }
  0x5e   :  { %v114_v2 = vsel %vm113_vm0, %v1648_v0, 0.0  ;;  %v117_v3 = vsel %vm113_vm0, %v1653_v1, 0.0  ;;  %v1292_v14 = vld [vmem:[%s1842_s4] sm:$0xff]   ;;  %1160 = vmatprep.subr.bf16.mxu0 %v1497_v15  ;;  %vm1498_vm1 = vmmov 0   ;;  %v1293_v16 = vld [vmem:[%s1842_s4 + $0x8] sm:$0xff]   ;;  %1168 = vmatprep.subr.bf16.mxu1 %v1497_v15  ;;  %s1501_s8 = smov 104  }
  0x5f   :  { %115 = vadd.xlane.f32.xlu0 %v114_v2  ;;  %1164 = vmatprep.mubr.msk.bf16.mxu0 %vm1498_vm1, %v1497_v15  ;;  %v1100_v33 = vld [vmem:[%s1840_s2] ss:$0 sm:$0xff]  ;;  %s1499_s2 = smov 112   ;;  %s1502_s28 = smov 96   ;;  %vm266_vm6 = vcmask 64512   ;;  %vm482_vm7 = vcmask 130048  }
  0x60   :  { %1161 = vmatpush3.bf16.msra.mxu0 %v1292_v14  ;;  %1170 = vmatprep.mubr.msk.bf16.mxu1 %vm1498_vm1, %v1497_v15  ;;  %v1101_v39 = vld [vmem:[%s1841_s3] ss:$0 sm:$0xff]  ;;  %s1500_s3 = smov 120   ;;  %s1505_s27 = smov 24   ;;  %vm791_vm8 = vcmask 195584   ;;  %vm1032_vm13 = vcmask 523264  }
  0x61   :  { %1162 = vmatprep.subr.bf16.mxu0 %v1497_v15  ;;  %v1102_v44 = vld [vmem:[#allocation2] ss:$0 sm:$0xff] }
  0x63   :  { %118 = vadd.xlane.f32.xlu0 %v117_v3 }
  0x64   :  { %1163 = vmatpush3.bf16.msra.mxu0 %v1293_v16 }
  0x65   :  { %1174 = vmatprep.subr.bf16.mxu0 %v1497_v15 }
  0xec   :  { %v116_v4 = vpop.xlane.xlu0 %115 }
  0xed   :  { %v121_v5 = vmul.f32 0.03125, %v116_v4 }
  0xef   :  { %v123_v6 = vsub.f32 %v1648_v0, %v121_v5 }
  0xf0   :  { %v119_v7 = vpop.xlane.xlu0 %118 }
  0xf1   :  { %v122_v8 = vmul.f32 0.03125, %v119_v7  ;;  %v125_v9 = vmul.f32 %v123_v6, %v123_v6  ;;  %v159_v35 = vmul.f32 %v1100_v33, %v123_v6 }
  0xf3   :  { %v124_v10 = vsub.f32 %v1653_v1, %v122_v8  ;;  %v127_v11 = vsel %vm113_vm0, %v125_v9, 0.0 }
  0xf4   :  { %128 = vadd.xlane.f32.xlu1 %v127_v11 }
  0xf5   :  { %v126_v12 = vmul.f32 %v124_v10, %v124_v10  ;;  %v160_v36 = vmul.f32 %v1100_v33, %v124_v10 }
  0xf7   :  { %v130_v13 = vsel %vm113_vm0, %v126_v12, 0.0  ;;  %v472_v12 = vld [vmem:[%s1839_s1] sm:$0xff] }
  0xf8   :  { %131 = vadd.xlane.f32.xlu1 %v130_v13 }
 0x181   :  { %v129_v17 = vpop.xlane.xlu1 %128 }
 0x182   :  { %v133_v18 = vmul.f32 0.032258064, %v129_v17  ;;  %v473_v17 = vld [vmem:[%s1839_s1 + $0x8] sm:$0xff]  ;;  %s1503_s1 = smov 8  }
 0x184   :  { %1302 = vrsqrt.f32 %v133_v18  ;;  %vm137_vm2 = vcmp.eq.f32.partialorder %v133_v18, inf  ;;  %v140_v23 = vand.u32 2147483648, %v133_v18  ;;  %vm139_vm3 = vcmp.eq.f32.partialorder %v133_v18, 0.0 }
 0x185   :  { %v132_v19 = vpop.xlane.xlu1 %131 }
 0x186   :  { %v134_v20 = vmul.f32 0.032258064, %v132_v19 }
 0x188   :  { %1304 = vrsqrt.f32 %v134_v20  ;;  %vm144_vm4 = vcmp.eq.f32.partialorder %v134_v20, inf  ;;  %v147_v29 = vand.u32 2147483648, %v134_v20  ;;  %vm146_vm5 = vcmp.eq.f32.partialorder %v134_v20, 0.0 }
 0x18e   :  { %v1303_v21 = vpop.eup %1302 }
 0x18f   :  { %v136_v22 = vmul.f32 %v1303_v21, %v133_v18 }
 0x191   :  { %v138_v24 = vsel %vm137_vm2, %v133_v18, %v136_v22 }
 0x192   :  { %v1305_v25 = vpop.eup %1304  ;;  %v141_v26 = vsel %vm139_vm3, %v140_v23, %v138_v24 }
 0x193   :  { %v149_v27 = vadd.f32 1e-06, %v141_v26  ;;  %v143_v28 = vmul.f32 %v1305_v25, %v134_v20 }
 0x195   :  { %1306 = vrcp.f32 %v149_v27  ;;  %v145_v30 = vsel %vm144_vm4, %v134_v20, %v143_v28 }
 0x196   :  { %v148_v31 = vsel %vm146_vm5, %v147_v29, %v145_v30 }
 0x197   :  { %v150_v32 = vadd.f32 1e-06, %v148_v31 }
 0x199   :  { %1308 = vrcp.f32 %v150_v32 }
 0x19f   :  { %v1307_v34 = vpop.eup %1306 }
 0x1a0   :  { %v161_v37 = vmul.f32 %v1307_v34, %v159_v35 }
 0x1a2   :  { %v169_v41 = vadd.f32 %v1101_v39, %v161_v37 }
 0x1a3   :  { %v1309_v38 = vpop.eup %1308 }
 0x1a4   :  { %v162_v40 = vmul.f32 %v1309_v38, %v160_v36 }
 0x1a6   :  { %v170_v42 = vadd.f32 %v1101_v39, %v162_v40 }
 0x1a8   :  { %v171_v43 = vpack.c.bf16 %v170_v42, %v169_v41 }
 0x1aa   :  { %1165 = vmatmul.mubr.msk.bf16.vlgmr.msra.gmra.mrb[0].mxu0 %vm113_vm0, %v171_v43 }
 0x1ab   :  { %1176 = vmatprep.mubr.msk.bf16.mxu0 %vm1498_vm1, %v1497_v15 }
 0x27d   :  { %v232_v45 = vpop.f32.mrb[0].mxu0 }
 0x27e   :  { %v1166_v46 = vpop.f32.mrb[1].mxu0  ;;  %v233_v48 = vadd.f32 %v1102_v44, %v232_v45 }
 0x27f   :  { %v235_v47 = vpop.f32.mrb[2].mxu0 }
 0x280   :  { %v236_v49 = vadd.f32 %v1102_v44, %v235_v47  ;;  %v1167_v50 = vpop.f32.mrb[3].mxu0 }
 0x282   :  { %v1267_v51 = vpack.i.bf16 %v236_v49, %v233_v48  ;;  %v1686_v52 = vpack.c.bf16 %v236_v49, %v233_v48 }
 0x284   :  { %1268 = vrot.lane.b32.xlu1 %v1267_v51, %s1499_s2  ;;  %1263 = vrot.lane.b32.xlu0 %v1267_v51, %s1500_s3 }
 0x288   :  { %1273 = vrot.lane.b32.xlu1 %v1267_v51, %s1501_s8 }
 0x28c   :  { %264 = vrot.lane.b32.xlu1 %v1686_v52, %s1502_s28 }
 0x2f6   :  { %v1269_v53 = vpop.permute.xlu1 %1268  ;;  %v1264_v54 = vpop.permute.xlu0 %1263 }
 0x2f7   :  { %v1271_v55 = vunpack.i.h.bf16 %v1269_v53  ;;  %v1270_v56 = vunpack.i.l.bf16 %v1269_v53  ;;  %v1266_v57 = vunpack.i.h.bf16 %v1264_v54  ;;  %v1265_v58 = vunpack.i.l.bf16 %v1264_v54 }
 0x2f9   :  { %v1689_v59 = vpack.c.bf16 %v1271_v55, %v1270_v56  ;;  %v1691_v60 = vpack.c.bf16 %v1266_v57, %v1265_v58 }
 0x2fa   :  { %v1274_v61 = vpop.permute.xlu1 %1273 }
 0x2fb   :  { %v1276_v62 = vunpack.i.h.bf16 %v1274_v61  ;;  %v1275_v63 = vunpack.i.l.bf16 %v1274_v61  ;;  %315 = vrot.lane.b32.xlu0 %v1691_v60, %s1502_s28  ;;  %365 = vrot.lane.b32.xlu1 %v1689_v59, %s1502_s28 }
 0x2fd   :  { %v1695_v2 = vpack.c.bf16 %v1276_v62, %v1275_v63 }
 0x2fe   :  { %v265_v3 = vpop.permute.xlu1 %264 }
 0x2ff   :  { %415 = vrot.lane.b32.xlu0 %v1695_v2, %s1502_s28  ;;  %v271_v4 = vsel %vm266_vm6, %v265_v3, 0 }
 0x300   :  { %1169 = vmatpush3.bf16.xpose.msra.mxu1 %v271_v4 }
 0x301   :  { %1180 = vmatprep.subr.bf16.mxu1 %v1497_v15 }
 0x307   :  { %1171 = vmatmul.mubr.msk.bf16.vlgmr.msra.gmra.mrb[0].mxu1 %vm266_vm6, %v1686_v52 }
 0x308   :  { %1182 = vmatprep.mubr.msk.bf16.mxu1 %vm1498_vm1, %v1497_v15 }
 0x36d   :  { %v316_v5 = vpop.permute.xlu0 %315  ;;  %v366_v6 = vpop.permute.xlu1 %365 }
 0x36e   :  { %v321_v7 = vsel %vm266_vm6, %v316_v5, 0  ;;  %v371_v8 = vsel %vm266_vm6, %v366_v6, 0 }
 0x36f   :  { %1175 = vmatpush3.bf16.xpose.msra.mxu0 %v321_v7  ;;  %1181 = vmatpush3.bf16.xpose.msra.mxu1 %v371_v8 }
 0x370   :  { %1186 = vmatprep.subr.bf16.mxu0 %v1497_v15  ;;  %1192 = vmatprep.subr.bf16.mxu1 %v1497_v15 }
 0x371   :  { %v416_v9 = vpop.permute.xlu0 %415 }
 0x372   :  { %v421_v10 = vsel %vm266_vm6, %v416_v9, 0 }
 0x376   :  { %1177 = vmatmul.mubr.msk.bf16.vlgmr.msra.gmra.mrb[4].mxu0 %vm266_vm6, %v1691_v60  ;;  %1183 = vmatmul.mubr.msk.bf16.vlgmr.msra.gmra.mrb[4].mxu1 %vm266_vm6, %v1689_v59 }
 0x377   :  { %1187 = vmatpush3.bf16.xpose.msra.mxu0 %v421_v10  ;;  %1188 = vmatprep.mubr.msk.bf16.mxu0 %vm1498_vm1, %v1497_v15 }
 0x378   :  { %1194 = vmatprep.mubr.msk.bf16.mxu1 %vm1498_vm1, %v1497_v15  ;;  %1198 = vmatprep.subr.bf16.mxu0 %v1497_v15 }
 0x37e   :  { %1189 = vmatmul.mubr.msk.bf16.vlgmr.msra.gmra.mrb[8].mxu0 %vm266_vm6, %v1695_v2 }
 0x37f   :  { %1200 = vmatprep.mubr.msk.bf16.mxu0 %vm1498_vm1, %v1497_v15 }
 0x3da   :  { %v307_v11 = vpop.f32.mrb[0].mxu1 }
 0x3db   :  { %v464_v13 = vmul.f32 0.35355338, %v307_v11  ;;  %v1172_v14 = vpop.f32.mrb[1].mxu1 }
 0x3dc   :  { %v310_v16 = vpop.f32.mrb[2].mxu1 }
 0x3dd   :  { %v465_v18 = vmul.f32 0.35355338, %v310_v16  ;;  %v1173_v19 = vpop.f32.mrb[3].mxu1  ;;  %v474_v20 = vadd.f32 %v472_v12, %v464_v13 }
 0x3df   :  { %v483_v21 = vsel %vm482_vm7, %v474_v20, -inf  ;;  %v475_v22 = vadd.f32 %v473_v17, %v465_v18 }
 0x3e0   :  { %484 = vmax.xlane.f32.xlu1 %v483_v21 }
 0x3e1   :  { %v486_v23 = vsel %vm482_vm7, %v475_v22, -inf }
 0x3e2   :  { %487 = vmax.xlane.f32.xlu0 %v486_v23 }
 0x449   :  { %v357_v24 = vpop.f32.mrb[4].mxu0  ;;  %v407_v25 = vpop.f32.mrb[4].mxu1 }
 0x44a   :  { %v466_v26 = vmul.f32 0.35355338, %v357_v24  ;;  %v468_v27 = vmul.f32 0.35355338, %v407_v25  ;;  %v1178_v28 = vpop.f32.mrb[5].mxu0  ;;  %v1184_v29 = vpop.f32.mrb[5].mxu1 }
 0x44b   :  { %v360_v30 = vpop.f32.mrb[6].mxu0  ;;  %v410_v31 = vpop.f32.mrb[6].mxu1 }
 0x44c   :  { %v467_v32 = vmul.f32 0.35355338, %v360_v30  ;;  %v1179_v33 = vpop.f32.mrb[7].mxu0  ;;  %v1185_v34 = vpop.f32.mrb[7].mxu1  ;;  %v478_v35 = vadd.f32 %v472_v12, %v468_v27  ;;  %v476_v36 = vadd.f32 %v472_v12, %v466_v26  ;;  %v469_v37 = vmul.f32 0.35355338, %v410_v31 }
 0x44e   :  { %v495_v38 = vsel %vm482_vm7, %v478_v35, -inf  ;;  %v489_v39 = vsel %vm482_vm7, %v476_v36, -inf  ;;  %v477_v40 = vadd.f32 %v473_v17, %v467_v32  ;;  %v479_v45 = vadd.f32 %v473_v17, %v469_v37 }
 0x44f   :  { %496 = vmax.xlane.f32.xlu1 %v495_v38  ;;  %490 = vmax.xlane.f32.xlu0 %v489_v39 }
 0x450   :  { %v492_v44 = vsel %vm482_vm7, %v477_v40, -inf  ;;  %v498_v50 = vsel %vm482_vm7, %v479_v45, -inf }
 0x451   :  { %v457_v41 = vpop.f32.mrb[8].mxu0 }
 0x452   :  { %v470_v42 = vmul.f32 0.35355338, %v457_v41  ;;  %v1190_v43 = vpop.f32.mrb[9].mxu0 }
 0x453   :  { %493 = vmax.xlane.f32.xlu0 %v492_v44  ;;  %v460_v46 = vpop.f32.mrb[10].mxu0 }
 0x454   :  { %v471_v47 = vmul.f32 0.35355338, %v460_v46  ;;  %v1191_v48 = vpop.f32.mrb[11].mxu0  ;;  %v480_v49 = vadd.f32 %v472_v12, %v470_v42 }
 0x456   :  { %v501_v51 = vsel %vm482_vm7, %v480_v49, -inf  ;;  %v481_v53 = vadd.f32 %v473_v17, %v471_v47 }
 0x457   :  { %499 = vmax.xlane.f32.xlu0 %v498_v50  ;;  %502 = vmax.xlane.f32.xlu1 %v501_v51 }
 0x458   :  { %v504_v54 = vsel %vm482_vm7, %v481_v53, -inf }
 0x45b   :  { %505 = vmax.xlane.f32.xlu0 %v504_v54 }
 0x468   :  { %575 = vrot.lane.b32.xlu1 %v1686_v52, %s1491_s23 }
 0x46d   :  { %v485_v58 = vpop.xlane.xlu1 %484 }
 0x46e   :  { %v507_v61 = vsub.f32 %v474_v20, %v485_v58 }
 0x46f   :  { %v488_v55 = vpop.xlane.xlu0 %487 }
 0x470   :  { %v508_v56 = vsub.f32 %v475_v22, %v488_v55  ;;  %v515_v62 = vmul.f32 1.442695, %v507_v61 }
 0x472   :  { %v517_v57 = vmul.f32 1.442695, %v508_v56 }
 0x474   :  { %1310 = vpow2.f32 %v517_v57 }
 0x475   :  { %1312 = vpow2.f32 %v515_v62 }
 0x47e   :  { %v1311_v63 = vpop.eup %1310 }
 0x47f   :  { %v534_v3 = vsel %vm482_vm7, %v1311_v63, 0.0  ;;  %v1313_v4 = vpop.eup %1312 }
 0x480   :  { %535 = vadd.xlane.f32.xlu0 %v534_v3  ;;  %v531_v5 = vsel %vm482_vm7, %v1313_v4, 0.0 }
 0x48c   :  { %532 = vadd.xlane.f32.xlu1 %v531_v5 }
 0x4dc   :  { %v497_v6 = vpop.xlane.xlu1 %496  ;;  %v491_v7 = vpop.xlane.xlu0 %490 }
 0x4dd   :  { %v511_v8 = vsub.f32 %v478_v35, %v497_v6  ;;  %v509_v52 = vsub.f32 %v476_v36, %v491_v7 }
 0x4df   :  { %v519_v9 = vmul.f32 1.442695, %v509_v52  ;;  %v523_v10 = vmul.f32 1.442695, %v511_v8 }
 0x4e0   :  { %v494_v11 = vpop.xlane.xlu0 %493 }
 0x4e1   :  { %v510_v12 = vsub.f32 %v477_v40, %v494_v11  ;;  %1314 = vpow2.f32 %v519_v9 }
 0x4e2   :  { %1316 = vpow2.f32 %v523_v10  ;;  %v1294_v10 = vld [vmem:[#allocation5] sm:$0xff]  }
 0x4e3   :  { %v521_v13 = vmul.f32 1.442695, %v510_v12 }
 0x4e4   :  { %v500_v14 = vpop.xlane.xlu0 %499  ;;  %v503_v16 = vpop.xlane.xlu1 %502 }
 0x4e5   :  { %1318 = vpow2.f32 %v521_v13  ;;  %v512_v17 = vsub.f32 %v479_v45, %v500_v14  ;;  %v513_v18 = vsub.f32 %v480_v49, %v503_v16  ;;  %v1295_v13 = vld [vmem:[#allocation5 + $0x8] sm:$0xff]  }
 0x4e7   :  { %v525_v19 = vmul.f32 1.442695, %v512_v17  ;;  %v527_v20 = vmul.f32 1.442695, %v513_v18 }
 0x4e8   :  { %v576_v21 = vpop.permute.xlu1 %575  ;;  %v506_v22 = vpop.xlane.xlu0 %505 }
 0x4e9   :  { %1320 = vpow2.f32 %v525_v19  ;;  %v514_v23 = vsub.f32 %v481_v53, %v506_v22  ;;  %1193 = vmatpush3.bf16.msra.mxu1 %v576_v21 }
 0x4ea   :  { %1322 = vpow2.f32 %v527_v20  ;;  %1204 = vmatprep.subr.bf16.mxu1 %v1497_v15 }
 0x4eb   :  { %v529_v24 = vmul.f32 1.442695, %v514_v23  ;;  %v1315_v25 = vpop.eup %1314 }
 0x4ec   :  { %v537_v26 = vsel %vm482_vm7, %v1315_v25, 0.0  ;;  %v1317_v27 = vpop.eup %1316 }
 0x4ed   :  { %1324 = vpow2.f32 %v529_v24  ;;  %538 = vadd.xlane.f32.xlu1 %v537_v26  ;;  %v543_v30 = vsel %vm482_vm7, %v1317_v27, 0.0 }
 0x4ef   :  { %v1319_v28 = vpop.eup %1318 }
 0x4f0   :  { %v540_v29 = vsel %vm482_vm7, %v1319_v28, 0.0 }
 0x4f1   :  { %541 = vadd.xlane.f32.xlu0 %v540_v29  ;;  %544 = vadd.xlane.f32.xlu1 %v543_v30 }
 0x4f3   :  { %v1321_v31 = vpop.eup %1320 }
 0x4f4   :  { %v1323_v32 = vpop.eup %1322  ;;  %v546_v33 = vsel %vm482_vm7, %v1321_v31, 0.0 }
 0x4f5   :  { %v549_v34 = vsel %vm482_vm7, %v1323_v32, 0.0  ;;  %547 = vadd.xlane.f32.xlu0 %v546_v33 }
 0x4f6   :  { %550 = vadd.xlane.f32.xlu1 %v549_v34 }
 0x4f7   :  { %v1325_v35 = vpop.eup %1324 }
 0x4f8   :  { %v552_v36 = vsel %vm482_vm7, %v1325_v35, 0.0 }
 0x4f9   :  { %553 = vadd.xlane.f32.xlu0 %v552_v36 }
 0x507   :  { %669 = vrot.lane.b32.xlu1 %v1689_v59, %s1491_s23 }
 0x50b   :  { %716 = vrot.lane.b32.xlu1 %v1695_v2, %s1491_s23 }
 0x50d   :  { %v536_v37 = vpop.xlane.xlu0 %535 }
 0x50e   :  { %1326 = vrcp.f32 %v536_v37 }
 0x50f   :  { %622 = vrot.lane.b32.xlu0 %v1691_v60, %s1491_s23  ;;  %s1504_s23 = smov 16  }
 0x518   :  { %v1327_v39 = vpop.eup %1326 }
 0x519   :  { %v533_v38 = vpop.xlane.xlu1 %532  ;;  %v564_v41 = vmul.f32 %v1327_v39, %v1311_v63 }
 0x51a   :  { %1328 = vrcp.f32 %v533_v38 }
 0x524   :  { %v1329_v40 = vpop.eup %1328 }
 0x525   :  { %v563_v42 = vmul.f32 %v1329_v40, %v1313_v4 }
 0x527   :  { %v571_v43 = vpack.c.bf16 %v564_v41, %v563_v42 }
 0x529   :  { %1195 = vmatmul.mubr.msk.bf16.vlgmr.msra.gmra.mrb[8].mxu1 %vm482_vm7, %v571_v43 }
 0x52a   :  { %1206 = vmatprep.mubr.msk.bf16.mxu1 %vm1498_vm1, %v1497_v15 }
 0x57a   :  { %v539_v59 = vpop.xlane.xlu1 %538 }
 0x57b   :  { %1330 = vrcp.f32 %v539_v59  ;;  %v1114_v59 = vld [vmem:[#allocation7] ss:$0 sm:$0xff] }
 0x57e   :  { %v542_v2 = vpop.xlane.xlu0 %541  ;;  %v545_v44 = vpop.xlane.xlu1 %544 }
 0x57f   :  { %1332 = vrcp.f32 %v542_v2 }
 0x580   :  { %1334 = vrcp.f32 %v545_v44 }
 0x582   :  { %v548_v60 = vpop.xlane.xlu0 %547 }
 0x583   :  { %v551_v45 = vpop.xlane.xlu1 %550  ;;  %1336 = vrcp.f32 %v548_v60 }
 0x584   :  { %1338 = vrcp.f32 %v551_v45 }
 0x585   :  { %v1331_v47 = vpop.eup %1330 }
 0x586   :  { %v554_v46 = vpop.xlane.xlu0 %553  ;;  %v565_v50 = vmul.f32 %v1331_v47, %v1315_v25 }
 0x587   :  { %v670_v48 = vpop.permute.xlu1 %669  ;;  %1340 = vrcp.f32 %v554_v46 }
 0x588   :  { %1205 = vmatpush3.bf16.msra.mxu1 %v670_v48 }
 0x589   :  { %v1333_v49 = vpop.eup %1332  ;;  %1216 = vmatprep.subr.bf16.mxu1 %v1497_v15 }
 0x58a   :  { %v566_v51 = vmul.f32 %v1333_v49, %v1319_v28  ;;  %v623_v53 = vpop.permute.xlu0 %622  ;;  %v1335_v54 = vpop.eup %1334 }
 0x58b   :  { %1199 = vmatpush3.bf16.msra.mxu0 %v623_v53  ;;  %v567_v57 = vmul.f32 %v1335_v54, %v1317_v27  ;;  %v717_v61 = vpop.permute.xlu1 %716 }
 0x58c   :  { %v572_v55 = vpack.c.bf16 %v566_v51, %v565_v50  ;;  %1210 = vmatprep.subr.bf16.mxu0 %v1497_v15 }
 0x58d   :  { %v1337_v56 = vpop.eup %1336 }
 0x58e   :  { %v568_v58 = vmul.f32 %v1337_v56, %v1321_v31  ;;  %1201 = vmatmul.mubr.msk.bf16.vlgmr.msra.gmra.mrb[12].mxu0 %vm482_vm7, %v572_v55  ;;  %v1339_v62 = vpop.eup %1338 }
 0x58f   :  { %1211 = vmatpush3.bf16.msra.mxu0 %v717_v61  ;;  %1212 = vmatprep.mubr.msk.bf16.mxu0 %vm1498_vm1, %v1497_v15  ;;  %v569_v4 = vmul.f32 %v1339_v62, %v1323_v32 }
 0x590   :  { %v573_v63 = vpack.c.bf16 %v568_v58, %v567_v57  ;;  %1224 = vmatprep.subr.bf16.mxu0 %v1497_v15 }
 0x591   :  { %v1341_v3 = vpop.eup %1340 }
 0x592   :  { %v570_v5 = vmul.f32 %v1341_v3, %v1325_v35  ;;  %1207 = vmatmul.mubr.msk.bf16.vlgmr.msra.gmra.mrb[12].mxu1 %vm482_vm7, %v573_v63  ;;  %v1296_v63 = vld [vmem:[%s1848_s10] sm:$0xff]   ;;  %v1297_v3 = vld [vmem:[%s1848_s10 + $0x8] sm:$0xff]  }
 0x593   :  { %1220 = vmatprep.mubr.msk.bf16.mxu1 %vm1498_vm1, %v1497_v15  ;;  %1217 = vmatpush3.bf16.msra.mxu1 %v1294_v10 }
 0x594   :  { %v574_v6 = vpack.c.bf16 %v570_v5, %v569_v4  ;;  %1218 = vmatprep.subr.bf16.mxu1 %v1497_v15  ;;  %v1298_v4 = vld [vmem:[%s1850_s12] sm:$0xff]   ;;  %v1299_v5 = vld [vmem:[%s1850_s12 + $0x8] sm:$0xff]  }
 0x596   :  { %1213 = vmatmul.mubr.msk.bf16.vlgmr.msra.gmra.mrb[16].mxu0 %vm482_vm7, %v574_v6 }
 0x597   :  { %1228 = vmatprep.mubr.msk.bf16.mxu0 %vm1498_vm1, %v1497_v15  ;;  %1219 = vmatpush3.bf16.msra.mxu1 %v1295_v13 }
 0x598   :  { %1232 = vmatprep.subr.bf16.mxu1 %v1497_v15  ;;  %1225 = vmatpush3.bf16.msra.mxu0 %v1296_v63 }
 0x599   :  { %1226 = vmatprep.subr.bf16.mxu0 %v1497_v15 }
 0x59c   :  { %1227 = vmatpush3.bf16.msra.mxu0 %v1297_v3 }
 0x5fc   :  { %v615_v7 = vpop.f32.mrb[8].mxu1 }
 0x5fd   :  { %v1196_v8 = vpop.f32.mrb[9].mxu1 }
 0x5fe   :  { %v618_v52 = vpop.f32.mrb[10].mxu1 }
 0x5ff   :  { %v1197_v9 = vpop.f32.mrb[11].mxu1 }
 0x661   :  { %v662_v11 = vpop.f32.mrb[12].mxu0 }
 0x662   :  { %v1202_v12 = vpop.f32.mrb[13].mxu0 }
 0x663   :  { %v665_v14 = vpop.f32.mrb[14].mxu0 }
 0x664   :  { %v1277_v16 = vpack.i.bf16 %v665_v14, %v662_v11  ;;  %v1203_v17 = vpop.f32.mrb[15].mxu0 }
 0x665   :  { %v709_v18 = vpop.f32.mrb[12].mxu1 }
 0x666   :  { %v1208_v19 = vpop.f32.mrb[13].mxu1  ;;  %1278 = vrot.lane.b32.xlu1 %v1277_v16, %s1503_s1 }
 0x667   :  { %v712_v20 = vpop.f32.mrb[14].mxu1 }
 0x668   :  { %v1282_v21 = vpack.i.bf16 %v712_v20, %v709_v18  ;;  %v1209_v22 = vpop.f32.mrb[15].mxu1 }
 0x669   :  { %v756_v23 = vpop.f32.mrb[16].mxu0  ;;  %v1118_v22 = vld [vmem:[#allocation8] ss:$0 sm:$0xff] }
 0x66a   :  { %1283 = vrot.lane.b32.xlu0 %v1282_v21, %s1504_s23  ;;  %v1214_v24 = vpop.f32.mrb[17].mxu0 }
 0x66b   :  { %v759_v25 = vpop.f32.mrb[18].mxu0 }
 0x66c   :  { %v1287_v26 = vpack.i.bf16 %v759_v25, %v756_v23  ;;  %v1215_v27 = vpop.f32.mrb[19].mxu0 }
 0x66e   :  { %1288 = vrot.lane.b32.xlu1 %v1287_v26, %s1505_s27 }
 0x6d8   :  { %v1279_v28 = vpop.permute.xlu1 %1278 }
 0x6d9   :  { %v1281_v30 = vunpack.i.h.bf16 %v1279_v28  ;;  %v1280_v31 = vunpack.i.l.bf16 %v1279_v28  ;;  %v1119_v28 = vld [vmem:[#allocation10] ss:$0 sm:$0xff] }
 0x6db   :  { %v788_v35 = vsel %vm266_vm6, %v618_v52, %v1281_v30  ;;  %v787_v36 = vsel %vm266_vm6, %v615_v7, %v1280_v31 }
 0x6dc   :  { %v1284_v29 = vpop.permute.xlu0 %1283 }
 0x6dd   :  { %v1286_v32 = vunpack.i.h.bf16 %v1284_v29  ;;  %v1285_v33 = vunpack.i.l.bf16 %v1284_v29 }
 0x6df   :  { %v789_v39 = vsel %vm482_vm7, %v787_v36, %v1285_v33  ;;  %v790_v40 = vsel %vm482_vm7, %v788_v35, %v1286_v32  ;;  %v1300_v33 = vld [vmem:[%s1850_s12 + $0x10] sm:$0xff]   ;;  %v1120_v35 = vld [vmem:[%s1849_s11] ss:$0 sm:$0xff]  ;;  %s1506_s11 = smov [#allocation11]  }
 0x6e0   :  { %v1289_v34 = vpop.permute.xlu1 %1288 }
 0x6e1   :  { %v1291_v37 = vunpack.i.h.bf16 %v1289_v34  ;;  %v1290_v38 = vunpack.i.l.bf16 %v1289_v34  ;;  %v1301_v34 = vld [vmem:[%s1850_s12 + $0x18] sm:$0xff]   ;;  %s1086_s12 = sshll.u32 %s1506_s11, 4  ;;  %s1087_s12 = int_to_ptr.vmem [resolvable:$true] %s1086_s12 }
 0x6e2   :  { %s1460_s2 = scalar_lea.vmem %s1087_s12, 256  ;;  %p1465_p13 = scmp.lt.s32.totalorder %s1087_s12, %s1087_s12 }
 0x6e3   :  { %v793_v41 = vsel %vm791_vm8, %v790_v40, %v1291_v37  ;;  %v792_v42 = vsel %vm791_vm8, %v789_v39, %v1290_v38  ;;  %p1461_p12 = scmp.ne.s32.totalorder %s1087_s12, %s1460_s2  ;;  %p1466_p0 = scmp.lt.s32.totalorder %s1460_s2, %s1460_s2 }
 0x6e4   :  { %v794_v43 = vpack.c.bf16 %v793_v41, %v792_v42 }
 0x6e5   :  { %p1467_p1 = por %p1466_p0, %p1465_p13 }
 0x6e6   :  { %1221 = vmatmul.mubr.msk.bf16.vlgmr.msra.gmra.mrb[16].mxu1 %vm113_vm0, %v794_v43 }
 0x6e7   :  { %1240 = vmatprep.mubr.msk.bf16.mxu1 %vm1498_vm1, %v1497_v15  ;;  %1233 = vmatpush3.bf16.msra.mxu1 %v1298_v4  ;;  %p1468_p2 = pnand %p1467_p1, %p1461_p12 }
 0x6e8   :  { %1234 = vmatprep.subr.bf16.mxu1 %v1497_v15 }
 0x6eb   :  { %1235 = vmatpush3.bf16.msra.mxu1 %v1299_v5 }
 0x6ec   :  { %1236 = vmatprep.subr.bf16.mxu1 %v1497_v15 }
 0x6ef   :  { %1237 = vmatpush3.bf16.msra.mxu1 %v1300_v33 }
 0x6f0   :  { %1238 = vmatprep.subr.bf16.mxu1 %v1497_v15  ;;  %v1124_v15 = vld [vmem:[%s1851_s13] ss:$0 sm:$0xff] }
 0x6f3   :  { %1239 = vmatpush3.bf16.msra.mxu1 %v1301_v34 }
 0x7b9   :  { %v855_v2 = vpop.f32.mrb[16].mxu1 }
 0x7ba   :  { %v856_v44 = vadd.f32 %v1114_v59, %v855_v2  ;;  %v1222_v60 = vpop.f32.mrb[17].mxu1 }
 0x7bb   :  { %v858_v45 = vpop.f32.mrb[18].mxu1 }
 0x7bc   :  { %v1779_v46 = vadd.f32 %v856_v44, %v1648_v0  ;;  %v859_v47 = vadd.f32 %v1114_v59, %v858_v45  ;;  %v1223_v48 = vpop.f32.mrb[19].mxu1 }
 0x7be   :  { %v1782_v49 = vadd.f32 %v859_v47, %v1653_v1  ;;  %v866_v50 = vsel %vm113_vm0, %v1779_v46, 0.0 }
 0x7bf   :  { %867 = vadd.xlane.f32.xlu0 %v866_v50 }
 0x7c0   :  { %v869_v51 = vsel %vm113_vm0, %v1782_v49, 0.0 }
 0x7c1   :  { %870 = vadd.xlane.f32.xlu1 %v869_v51 }
 0x84c   :  { %v868_v53 = vpop.xlane.xlu0 %867 }
 0x84d   :  { %v872_v54 = vmul.f32 0.03125, %v868_v53 }
 0x84e   :  { %v871_v55 = vpop.xlane.xlu1 %870 }
 0x84f   :  { %v874_v56 = vsub.f32 %v1779_v46, %v872_v54  ;;  %v873_v0 = vmul.f32 0.03125, %v871_v55 }
 0x851   :  { %v875_v57 = vsub.f32 %v1782_v49, %v873_v0  ;;  %v876_v58 = vmul.f32 %v874_v56, %v874_v56  ;;  %v910_v24 = vmul.f32 %v1118_v22, %v874_v56 }
 0x853   :  { %v878_v1 = vsel %vm113_vm0, %v876_v58, 0.0  ;;  %v877_v61 = vmul.f32 %v875_v57, %v875_v57  ;;  %v911_v25 = vmul.f32 %v1118_v22, %v875_v57 }
 0x854   :  { %879 = vadd.xlane.f32.xlu0 %v878_v1 }
 0x855   :  { %v881_v62 = vsel %vm113_vm0, %v877_v61, 0.0 }
 0x858   :  { %882 = vadd.xlane.f32.xlu0 %v881_v62 }
 0x8e1   :  { %v880_v6 = vpop.xlane.xlu0 %879 }
 0x8e2   :  { %v884_v7 = vmul.f32 0.032258064, %v880_v6 }
 0x8e4   :  { %1342 = vrsqrt.f32 %v884_v7  ;;  %vm888_vm9 = vcmp.eq.f32.partialorder %v884_v7, inf  ;;  %v891_v11 = vand.u32 2147483648, %v884_v7  ;;  %vm890_vm10 = vcmp.eq.f32.partialorder %v884_v7, 0.0 }
 0x8e5   :  { %v883_v8 = vpop.xlane.xlu0 %882 }
 0x8e6   :  { %v885_v52 = vmul.f32 0.032258064, %v883_v8 }
 0x8e8   :  { %1344 = vrsqrt.f32 %v885_v52  ;;  %vm895_vm11 = vcmp.eq.f32.partialorder %v885_v52, inf  ;;  %v898_v18 = vand.u32 2147483648, %v885_v52  ;;  %vm897_vm12 = vcmp.eq.f32.partialorder %v885_v52, 0.0 }
 0x8ee   :  { %v1343_v9 = vpop.eup %1342 }
 0x8ef   :  { %v887_v10 = vmul.f32 %v1343_v9, %v884_v7 }
 0x8f1   :  { %v889_v12 = vsel %vm888_vm9, %v884_v7, %v887_v10 }
 0x8f2   :  { %v1345_v13 = vpop.eup %1344  ;;  %v892_v14 = vsel %vm890_vm10, %v891_v11, %v889_v12 }
 0x8f3   :  { %v900_v16 = vadd.f32 1e-06, %v892_v14  ;;  %v894_v17 = vmul.f32 %v1345_v13, %v885_v52 }
 0x8f5   :  { %1346 = vrcp.f32 %v900_v16  ;;  %v896_v19 = vsel %vm895_vm11, %v885_v52, %v894_v17 }
 0x8f6   :  { %v899_v20 = vsel %vm897_vm12, %v898_v18, %v896_v19 }
 0x8f7   :  { %v901_v21 = vadd.f32 1e-06, %v899_v20 }
 0x8f9   :  { %1348 = vrcp.f32 %v901_v21 }
 0x8ff   :  { %v1347_v23 = vpop.eup %1346 }
 0x900   :  { %v912_v26 = vmul.f32 %v1347_v23, %v910_v24 }
 0x902   :  { %v920_v30 = vadd.f32 %v1119_v28, %v912_v26 }
 0x903   :  { %v1349_v27 = vpop.eup %1348 }
 0x904   :  { %v913_v29 = vmul.f32 %v1349_v27, %v911_v25 }
 0x906   :  { %v921_v31 = vadd.f32 %v1119_v28, %v913_v29 }
 0x908   :  { %v922_v32 = vpack.c.bf16 %v921_v31, %v920_v30 }
 0x90a   :  { %1229 = vmatmul.mubr.msk.bf16.vlgmr.msra.gmra.mrb[20].mxu0 %vm113_vm0, %v922_v32 }
 0x9dd   :  { %v983_v36 = vpop.f32.mrb[20].mxu0 }
 0x9de   :  { %v984_v37 = vadd.f32 %v1120_v35, %v983_v36  ;;  %v1230_v38 = vpop.f32.mrb[21].mxu0 }
 0x9df   :  { %v986_v39 = vpop.f32.mrb[22].mxu0 }
 0x9e0   :  { %v987_v40 = vadd.f32 %v1120_v35, %v986_v39  ;;  %v1231_v41 = vpop.f32.mrb[23].mxu0  ;;  %v990_v42 = vmax.f32 %v984_v37, 0.0 }
 0x9e2   :  { %v991_v43 = vmax.f32 %v987_v40, 0.0 }
 0x9e4   :  { %v992_v59 = vpack.c.bf16 %v991_v43, %v990_v42 }
 0x9e6   :  { %1241 = vmatmul.mubr.msk.bf16.vlgmr.msra.gmra.mrb[20].mxu1 %vm1032_vm13, %v992_v59 }
 0xab9   :  { %v1070_v2 = vpop.f32.mrb[20].mxu1 }
 0xaba   :  { %v1071_v44 = vadd.f32 %v1124_v15, %v1070_v2  ;;  %v1242_v60 = vpop.f32.mrb[21].mxu1 }
 0xabb   :  { %v1073_v45 = vpop.f32.mrb[22].mxu1 }
 0xabc   :  { %v1077_v47 = vadd.f32 %v1071_v44, %v1779_v46  ;;  %v1074_v48 = vadd.f32 %v1124_v15, %v1073_v45  ;;  %v1243_v50 = vpop.f32.mrb[23].mxu1 }
 0xabe   :  { %1079 = vst.msk [vmem:[#allocation11] sm:$0xff] %vm113_vm0, %v1077_v47  ;;  %v1078_v51 = vadd.f32 %v1074_v48, %v1782_v49 }
 0xac0   :  { %1080 = vst.msk [vmem:[#allocation11 + $0x8] sm:$0xff] %vm113_vm0, %v1078_v51 }
 0xac1   :  { %1471 = shalt.err (!%p1468_p2)
}
 0xac2   :  { %s1472_s8 = scalar_lea.hbm %s1852_s14, 256 }
 0xac3   :  { %p1473_p3 = scmp.ne.s32.totalorder %s1852_s14, %s1472_s8  ;;  %p1476_p4 = scmp.lt.u32.totalorder %s1472_s8, %s1852_s14 }
 0xac5   :  { %p1478_p5 = pnand %p1476_p4, %p1473_p3 }
 0xac7   :  { %1481 = shalt.err (!%p1478_p5)
}
 0xac8   :  { %s1507_s26 = smov 128  }
 0xac9   :  { %1092 = dma.vmem_to_hbm [thread:$0]  %s1087_s12, 256, %s1852_s14, [#allocation4], %s1507_s26, %s1507_s26, %s1503_s1  }
 0xaca   :  { %1488 = dma.done.wait [#allocation4], 256  }
 0xacb   :  { %1489 = vsyncadd [#allocation4], 4294967040 }
 0xacc   :  { %1096 = vsyncpa [#allocation3], 1 }
 0xacd   :  { %1097 = vsyncpa [#allocation6], 1 }
 0xace   :  { %1098 = vsyncpa [#allocation9], 1 }
 0xacf   :  { %1099 = vsyncpa [#allocation4], 1 }

</bundles_post_ra>
